<compile_context>
chip_gen: v5e
topology: v5e:2x2
jax: 0.10.0
libtpu: 0.0.40
codegen_flags: <defaults>
</compile_context>

<pallas_src>
import numpy as np
import jax
import jax.numpy as jnp
from jax.experimental import pallas as pl
from jax.experimental.pallas import tpu as pltpu  # noqa: F401  (imported for TPU backend parity)


# ---------------------------------------------------------------------------
# Fused Pallas kernel: entire CNN2 forward in one launch
# ---------------------------------------------------------------------------

def _cnn2_fused_kernel(x_ref, wa_ref, ba_ref, wb_ref, bb_ref,
                       m1_ref, m2_ref, b5a_ref, w5b_ref, b5b_ref, o_ref):
    # Stage 1: all first-level convs (conv1, conv2, conv3a, conv4a) as one matmul.
    h1 = jnp.dot(x_ref[...], wa_ref[...], preferred_element_type=jnp.float32)
    h1 = jnp.maximum(h1 + ba_ref[...], 0.0)                       # (B, N1)

    # Stage 2: second-level convs (conv3b, conv4b) reading their h1 slices.
    g = jnp.dot(h1, wb_ref[...], preferred_element_type=jnp.float32)
    g = jnp.maximum(g + bb_ref[...], 0.0)                         # (B, 2*C*2)

    # Stage 3: branch sum (x1 bcast + x2 + x3 + x4), flatten, and Linear1 — all
    # folded into two matmuls via precomputed M1 = P1@W5a, M2 = P2@W5a.
    h = (jnp.dot(h1, m1_ref[...], preferred_element_type=jnp.float32)
         + jnp.dot(g, m2_ref[...], preferred_element_type=jnp.float32)
         + b5a_ref[...])
    h = jnp.maximum(h, 0.0)                                       # (B, C)

    # Stage 4: Linear2 + numerically-stable softmax over classes.
    logits = jnp.dot(h, w5b_ref[...], preferred_element_type=jnp.float32)
    logits = logits + b5b_ref[...]
    m = jnp.max(logits, axis=-1, keepdims=True)
    e = jnp.exp(logits - m)
    o_ref[...] = e / jnp.sum(e, axis=-1, keepdims=True)


def cnn2_fused_call(xflat, f):
    """xflat: (B, Cin*H) f32; f: dict of prepacked fused matrices."""
    B, Kin = xflat.shape
    N1 = f["Wa"].shape[1]
    N2 = f["Wb"].shape[1]
    Hd = f["M1"].shape[1]
    NC = f["W5b"].shape[1]
    spec2 = lambda shp: pl.BlockSpec(shp, lambda i: (0, 0))
    return pl.pallas_call(
        _cnn2_fused_kernel,
        out_shape=jax.ShapeDtypeStruct((B, NC), jnp.float32),
        grid=(1,),
        in_specs=[
            spec2((B, Kin)),
            spec2((Kin, N1)), spec2((1, N1)),
            spec2((N1, N2)), spec2((1, N2)),
            spec2((N1, Hd)), spec2((N2, Hd)), spec2((1, Hd)),
            spec2((Hd, NC)), spec2((1, NC)),
        ],
        out_specs=spec2((B, NC)),
    )(xflat, f["Wa"], f["ba"], f["Wb"], f["bb"],
      f["M1"], f["M2"], f["b5a"], f["W5b"], f["b5b"])


def cnn2_forward(fused, x):
    """x: (B, L_FIRST, H, 1) NCHW. Returns (softmax probs (B, CLASSES), x)."""
    B = x.shape[0]
    xflat = x.reshape(B, -1).astype(jnp.float32)   # channel-major flatten (W==1)
    out = cnn2_fused_call(xflat, fused)
    return out, x


# ---------------------------------------------------------------------------
# One-time parameter preparation (all transposes / Toeplitz expansion hoisted)
# ---------------------------------------------------------------------------

def _conv_matrix(w, b, Hin, stride, pad):
    """Expand a (K,1) Conv2d (PyTorch layout) into a dense (Cin*Hin, Cout*Hout)
    matrix M acting on channel-major flattened activations (idx = c*H + h),
    plus the bias broadcast over output positions (length Cout*Hout)."""
    w = np.asarray(w, dtype=np.float32)[..., 0]       # (Cout, Cin, K)
    b = np.asarray(b, dtype=np.float32)
    Cout, Cin, K = w.shape
    Hout = (Hin + 2 * pad - K) // stride + 1
    M = np.zeros((Cin * Hin, Cout * Hout), dtype=np.float32)
    for co in range(Cout):
        for ho in range(Hout):
            for ci in range(Cin):
                for k in range(K):
                    hi = ho * stride + k - pad
                    if 0 <= hi < Hin:
                        M[ci * Hin + hi, co * Hout + ho] = w[co, ci, k]
    bias = np.repeat(b, Hout)
    return M, bias, Hout


def prepare_fused_params(params, L_FIRST, C, H):
    """Build the fused matmul matrices consumed by the single Pallas kernel."""
    M1c, b1c, H1 = _conv_matrix(params["w1"], params["b1"], H, 1, 0)      # Hout=1
    M2c, b2c, H2 = _conv_matrix(params["w2"], params["b2"], H, 2, 1)      # Hout=2
    M3a, b3a, H3a = _conv_matrix(params["w3a"], params["b3a"], H, 1, 6)   # Hout=13
    M4a, b4a, H4a = _conv_matrix(params["w4a"], params["b4a"], H, 1, 0)   # Hout=13
    M3b, b3b, H3b = _conv_matrix(params["w3b"], params["b3b"], H3a, 1, 6)  # Hout=2
    M4b, b4b, H4b = _conv_matrix(params["w4b"], params["b4b"], H4a, 1, 0)  # Hout=2
    assert H1 == 1 and H2 == H3b == H4b == 2

    n1, n2, n3, n4 = C * H1, C * H2, C * H3a, C * H4a

    # Stage 1: fuse the four first-level convs along the lane (N) axis.
    Wa = np.concatenate([M1c, M2c, M3a, M4a], axis=1)        # (Cin*H, N1)
    ba = np.concatenate([b1c, b2c, b3a, b4a])[None, :]
    N1 = Wa.shape[1]

    # Stage 2: second-level convs read their slices of the stage-1 slab.
    Wb = np.zeros((N1, C * H3b + C * H4b), dtype=np.float32)
    o3 = n1 + n2
    o4 = o3 + n3
    Wb[o3:o3 + n3, :C * H3b] = M3b
    Wb[o4:o4 + n4, C * H3b:] = M4b
    bb = np.concatenate([np.repeat(np.asarray(params["b3b"], np.float32), H3b),
                         np.repeat(np.asarray(params["b4b"], np.float32), H4b)])[None, :]

    # Stage 3: fold x5 = x1(bcast) + x2 + x3 + x4, .view(B,-1) (c*2+h order) and
    # the first Linear into M1 = P1 @ W5a (from h1) and M2 = P2 @ W5a (from g).
    Hs = H2
    F = C * Hs                                               # == 2*C
    P1 = np.zeros((N1, F), dtype=np.float32)
    for c in range(C):
        for h in range(Hs):
            P1[c, c * Hs + h] += 1.0                         # x1 broadcast over h
    P1[n1:n1 + n2, :] += np.eye(n2, dtype=np.float32)        # x2 identity (n2 == F)
    P2 = np.concatenate([np.eye(F, dtype=np.float32),
                         np.eye(F, dtype=np.float32)], axis=0)  # x3 + x4

    W5a = np.asarray(params["w5a"], dtype=np.float32).T      # (2C, C)
    W5b = np.asarray(params["w5b"], dtype=np.float32).T      # (C, CLASSES)

    fused = {
        "Wa": Wa, "ba": ba,
        "Wb": Wb, "bb": bb,
        "M1": P1 @ W5a, "M2": P2 @ W5a,
        "b5a": np.asarray(params["b5a"], np.float32)[None, :],
        "W5b": W5b,
        "b5b": np.asarray(params["b5b"], np.float32)[None, :],
    }
    return {k: jnp.asarray(v) for k, v in fused.items()}


# ---------------------------------------------------------------------------
# Plain-JAX reference (mirrors the PyTorch module) for a correctness cross-check
# ---------------------------------------------------------------------------

def _conv_relu_ref(x, w, b, stride, pad):
    B, Cin, H = x.shape
    Cout, _, K, _ = w.shape
    xp = jnp.pad(x, ((0, 0), (0, 0), (pad, pad)))
    Hout = (H + 2 * pad - K) // stride + 1
    idx = jnp.arange(Hout)[:, None] * stride + jnp.arange(K)[None, :]
    patches = xp[:, :, idx]                                   # (B, Cin, Hout, K)
    y = jnp.einsum("bchk,ock->boh", patches, w[..., 0]) + b[None, :, None]
    return jnp.maximum(y, 0.0)


def cnn2_reference(params, x):
    x3d = x[..., 0].astype(jnp.float32)
    x1 = _conv_relu_ref(x3d, params["w1"], params["b1"], 1, 0)
    x2 = _conv_relu_ref(x3d, params["w2"], params["b2"], 2, 1)
    x3 = _conv_relu_ref(_conv_relu_ref(x3d, params["w3a"], params["b3a"], 1, 6),
                        params["w3b"], params["b3b"], 1, 6)
    x4 = _conv_relu_ref(_conv_relu_ref(x3d, params["w4a"], params["b4a"], 1, 0),
                        params["w4b"], params["b4b"], 1, 0)
    x5 = x1 + x2 + x3 + x4
    x9 = x5.reshape(x5.shape[0], -1)
    h = jnp.maximum(x9 @ params["w5a"].T + params["b5a"], 0.0)
    logits = h @ params["w5b"].T + params["b5b"]
    return jax.nn.softmax(logits, axis=1)


# ---------------------------------------------------------------------------
# Deterministic parameter construction + run
# ---------------------------------------------------------------------------

def init_params(key, L_FIRST, C, KERNEL_X, CLASSES):
    ks = jax.random.split(key, 16)
    n = lambda k, shp: (jax.random.normal(k, shp, jnp.float32) * 0.05)
    return {
        "w1":  n(ks[0],  (C, L_FIRST, KERNEL_X, 1)), "b1":  n(ks[1],  (C,)),
        "w2":  n(ks[2],  (C, L_FIRST, KERNEL_X, 1)), "b2":  n(ks[3],  (C,)),
        "w3a": n(ks[4],  (C, L_FIRST, KERNEL_X, 1)), "b3a": n(ks[5],  (C,)),
        "w3b": n(ks[6],  (C, C,       KERNEL_X, 1)), "b3b": n(ks[7],  (C,)),
        "w4a": n(ks[8],  (C, L_FIRST, 12,       1)), "b4a": n(ks[9],  (C,)),
        "w4b": n(ks[10], (C, C,       12,       1)), "b4b": n(ks[11], (C,)),
        "w5a": n(ks[12], (C, 2 * C)),                "b5a": n(ks[13], (C,)),
        "w5b": n(ks[14], (CLASSES, C)),              "b5b": n(ks[15], (CLASSES,)),
    }


if __name__ == "__main__":
    # Module hyperparameters (shape-consistency forces KERNEL_X=24, H=24, W=1)
    B, L_FIRST, SCI_L_SECOND, KERNEL_X, CLASSES = 2, 4, 8, 24, 3
    H, W = 24, 1
    # SCI_BIAS=True; SCI_RELU / SCI_DROPOUT / SCI_BN_MOMENTUM have no effect at eval.

    key = jax.random.PRNGKey(0)
    kx, kp = jax.random.split(key)
    x = jax.random.normal(kx, (B, L_FIRST, H, W), jnp.float32)
    params = init_params(kp, L_FIRST, SCI_L_SECOND, KERNEL_X, CLASSES)
    fused = prepare_fused_params(params, L_FIRST, SCI_L_SECOND, H)

    fwd = jax.jit(cnn2_forward)
    out, x_echo = fwd(fused, x)
    out = jax.block_until_ready(out)
    x_echo = jax.block_until_ready(x_echo)

    assert out.shape == (B, CLASSES)
    assert x_echo.shape == (B, L_FIRST, H, W)
    # Softmax rows must sum to 1.
    assert bool(jnp.allclose(jnp.sum(out, axis=1), 1.0, atol=1e-5))
    # Cross-check against a plain-JAX reference of the PyTorch forward.
    ref = cnn2_reference(params, x)
    assert bool(jnp.allclose(out, ref, atol=2e-3, rtol=2e-2)), "mismatch vs reference"

    print("KERNEL_OK")
</pallas_src>

<mosaic_0001>
module attributes {stable_mosaic.version = 11 : i64} {
  func.func @_cnn2_fused_kernel(%arg0: i32, %arg1: memref<2x96xf32, #tpu.memory_space<vmem>>, %arg2: memref<96x232xf32, #tpu.memory_space<vmem>>, %arg3: memref<1x232xf32, #tpu.memory_space<vmem>>, %arg4: memref<232x32xf32, #tpu.memory_space<vmem>>, %arg5: memref<1x32xf32, #tpu.memory_space<vmem>>, %arg6: memref<232x8xf32, #tpu.memory_space<vmem>>, %arg7: memref<32x8xf32, #tpu.memory_space<vmem>>, %arg8: memref<1x8xf32, #tpu.memory_space<vmem>>, %arg9: memref<8x3xf32, #tpu.memory_space<vmem>>, %arg10: memref<1x3xf32, #tpu.memory_space<vmem>>, %arg11: memref<2x3xf32, #tpu.memory_space<vmem>>) attributes {dimension_semantics = [#tpu.dimension_semantics<arbitrary>], iteration_bounds = array<i64: 1>, scalar_prefetch = 0 : i64, scratch_operands = 0 : i64, tpu.core_type = #tpu.core_type<tc>, window_params = [{pipeline_mode = #tpu.pipeline_mode<synchronous>, transform_indices = @transform_0, window_bounds = array<i64: 2, 96>}, {pipeline_mode = #tpu.pipeline_mode<synchronous>, transform_indices = @transform_1, window_bounds = array<i64: 96, 232>}, {pipeline_mode = #tpu.pipeline_mode<synchronous>, transform_indices = @transform_2, window_bounds = array<i64: 1, 232>}, {pipeline_mode = #tpu.pipeline_mode<synchronous>, transform_indices = @transform_3, window_bounds = array<i64: 232, 32>}, {pipeline_mode = #tpu.pipeline_mode<synchronous>, transform_indices = @transform_4, window_bounds = array<i64: 1, 32>}, {pipeline_mode = #tpu.pipeline_mode<synchronous>, transform_indices = @transform_5, window_bounds = array<i64: 232, 8>}, {pipeline_mode = #tpu.pipeline_mode<synchronous>, transform_indices = @transform_6, window_bounds = array<i64: 32, 8>}, {pipeline_mode = #tpu.pipeline_mode<synchronous>, transform_indices = @transform_7, window_bounds = array<i64: 1, 8>}, {pipeline_mode = #tpu.pipeline_mode<synchronous>, transform_indices = @transform_8, window_bounds = array<i64: 8, 3>}, {pipeline_mode = #tpu.pipeline_mode<synchronous>, transform_indices = @transform_9, window_bounds = array<i64: 1, 3>}, {pipeline_mode = #tpu.pipeline_mode<synchronous>, transform_indices = @transform_10, window_bounds = array<i64: 2, 3>}]} {
    %c0 = arith.constant 0 : index
    %c0_0 = arith.constant 0 : index
    %0 = vector.load %arg1[%c0, %c0_0] : memref<2x96xf32, #tpu.memory_space<vmem>>, vector<2x96xf32>
    %c0_1 = arith.constant 0 : index
    %c0_2 = arith.constant 0 : index
    %1 = vector.load %arg2[%c0_1, %c0_2] : memref<96x232xf32, #tpu.memory_space<vmem>>, vector<96x232xf32>
    %cst = arith.constant dense<0.000000e+00> : vector<2x232xf32>
    %2 = tpu.matmul %0, %1, %cst {dimension_numbers = #tpu.dot_dimension_numbers<[1], [0], [0], [1], [0, 0, 1, 1], [], []>} : vector<2x96xf32>, vector<96x232xf32>, vector<2x232xf32> -> vector<2x232xf32>
    %c0_3 = arith.constant 0 : index
    %c0_4 = arith.constant 0 : index
    %3 = vector.load %arg3[%c0_3, %c0_4] : memref<1x232xf32, #tpu.memory_space<vmem>>, vector<1x232xf32>
    %4 = vector.broadcast %3 : vector<1x232xf32> to vector<2x232xf32>
    %5 = arith.addf %2, %4 : vector<2x232xf32>
    %cst_5 = arith.constant 0.000000e+00 : f32
    %6 = vector.broadcast %cst_5 : f32 to vector<2x232xf32>
    %7 = arith.maximumf %5, %6 : vector<2x232xf32>
    %c0_6 = arith.constant 0 : index
    %c0_7 = arith.constant 0 : index
    %8 = vector.load %arg4[%c0_6, %c0_7] : memref<232x32xf32, #tpu.memory_space<vmem>>, vector<232x32xf32>
    %cst_8 = arith.constant dense<0.000000e+00> : vector<2x32xf32>
    %9 = tpu.matmul %7, %8, %cst_8 {dimension_numbers = #tpu.dot_dimension_numbers<[1], [0], [0], [1], [0, 0, 1, 1], [], []>} : vector<2x232xf32>, vector<232x32xf32>, vector<2x32xf32> -> vector<2x32xf32>
    %c0_9 = arith.constant 0 : index
    %c0_10 = arith.constant 0 : index
    %10 = vector.load %arg5[%c0_9, %c0_10] : memref<1x32xf32, #tpu.memory_space<vmem>>, vector<1x32xf32>
    %11 = vector.broadcast %10 : vector<1x32xf32> to vector<2x32xf32>
    %12 = arith.addf %9, %11 : vector<2x32xf32>
    %cst_11 = arith.constant 0.000000e+00 : f32
    %13 = vector.broadcast %cst_11 : f32 to vector<2x32xf32>
    %14 = arith.maximumf %12, %13 : vector<2x32xf32>
    %c0_12 = arith.constant 0 : index
    %c0_13 = arith.constant 0 : index
    %15 = vector.load %arg6[%c0_12, %c0_13] : memref<232x8xf32, #tpu.memory_space<vmem>>, vector<232x8xf32>
    %cst_14 = arith.constant dense<0.000000e+00> : vector<2x8xf32>
    %16 = tpu.matmul %7, %15, %cst_14 {dimension_numbers = #tpu.dot_dimension_numbers<[1], [0], [0], [1], [0, 0, 1, 1], [], []>} : vector<2x232xf32>, vector<232x8xf32>, vector<2x8xf32> -> vector<2x8xf32>
    %c0_15 = arith.constant 0 : index
    %c0_16 = arith.constant 0 : index
    %17 = vector.load %arg7[%c0_15, %c0_16] : memref<32x8xf32, #tpu.memory_space<vmem>>, vector<32x8xf32>
    %cst_17 = arith.constant dense<0.000000e+00> : vector<2x8xf32>
    %18 = tpu.matmul %14, %17, %cst_17 {dimension_numbers = #tpu.dot_dimension_numbers<[1], [0], [0], [1], [0, 0, 1, 1], [], []>} : vector<2x32xf32>, vector<32x8xf32>, vector<2x8xf32> -> vector<2x8xf32>
    %19 = arith.addf %16, %18 : vector<2x8xf32>
    %c0_18 = arith.constant 0 : index
    %c0_19 = arith.constant 0 : index
    %20 = vector.load %arg8[%c0_18, %c0_19] : memref<1x8xf32, #tpu.memory_space<vmem>>, vector<1x8xf32>
    %21 = vector.broadcast %20 : vector<1x8xf32> to vector<2x8xf32>
    %22 = arith.addf %19, %21 : vector<2x8xf32>
    %cst_20 = arith.constant 0.000000e+00 : f32
    %23 = vector.broadcast %cst_20 : f32 to vector<2x8xf32>
    %24 = arith.maximumf %22, %23 : vector<2x8xf32>
    %c0_21 = arith.constant 0 : index
    %c0_22 = arith.constant 0 : index
    %25 = vector.load %arg9[%c0_21, %c0_22] : memref<8x3xf32, #tpu.memory_space<vmem>>, vector<8x3xf32>
    %cst_23 = arith.constant dense<0.000000e+00> : vector<2x3xf32>
    %26 = tpu.matmul %24, %25, %cst_23 {dimension_numbers = #tpu.dot_dimension_numbers<[1], [0], [0], [1], [0, 0, 1, 1], [], []>} : vector<2x8xf32>, vector<8x3xf32>, vector<2x3xf32> -> vector<2x3xf32>
    %c0_24 = arith.constant 0 : index
    %c0_25 = arith.constant 0 : index
    %27 = vector.load %arg10[%c0_24, %c0_25] : memref<1x3xf32, #tpu.memory_space<vmem>>, vector<1x3xf32>
    %28 = vector.broadcast %27 : vector<1x3xf32> to vector<2x3xf32>
    %29 = arith.addf %26, %28 : vector<2x3xf32>
    %cst_26 = arith.constant dense<0xFF800000> : vector<2xf32>
    %30 = vector.multi_reduction <maximumf>, %29, %cst_26 [1] : vector<2x3xf32> to vector<2xf32>
    %31 = vector.shape_cast %30 : vector<2xf32> to vector<2x1xf32>
    %32 = vector.broadcast %31 : vector<2x1xf32> to vector<2x3xf32>
    %33 = arith.subf %29, %32 : vector<2x3xf32>
    %34 = math.exp %33 : vector<2x3xf32>
    %cst_27 = arith.constant dense<0.000000e+00> : vector<2xf32>
    %35 = vector.multi_reduction <add>, %34, %cst_27 [1] : vector<2x3xf32> to vector<2xf32>
    %36 = vector.shape_cast %35 : vector<2xf32> to vector<2x1xf32>
    %37 = vector.broadcast %36 : vector<2x1xf32> to vector<2x3xf32>
    %38 = arith.divf %34, %37 : vector<2x3xf32>
    %c0_28 = arith.constant 0 : index
    %c0_29 = arith.constant 0 : index
    %39 = vector.load %arg11[%c0_28, %c0_29] : memref<2x3xf32, #tpu.memory_space<vmem>>, vector<2x3xf32>
    tpu.vector_store %arg11[%c0_28, %c0_29], %38 {strides = array<i32>} : memref<2x3xf32, #tpu.memory_space<vmem>>, vector<2x3xf32>,
    return
  }
  func.func @transform_0(%arg0: i32) -> (i32, i32) {
    %c0_i32 = arith.constant 0 : i32
    %c0_i32_0 = arith.constant 0 : i32
    %c0_i32_1 = arith.constant 0 : i32
    return %c0_i32, %c0_i32_0 : i32, i32
  }
  func.func @transform_1(%arg0: i32) -> (i32, i32) {
    %c0_i32 = arith.constant 0 : i32
    %c0_i32_0 = arith.constant 0 : i32
    %c0_i32_1 = arith.constant 0 : i32
    return %c0_i32, %c0_i32_0 : i32, i32
  }
  func.func @transform_2(%arg0: i32) -> (i32, i32) {
    %c0_i32 = arith.constant 0 : i32
    %c0_i32_0 = arith.constant 0 : i32
    %c0_i32_1 = arith.constant 0 : i32
    return %c0_i32, %c0_i32_0 : i32, i32
  }
  func.func @transform_3(%arg0: i32) -> (i32, i32) {
    %c0_i32 = arith.constant 0 : i32
    %c0_i32_0 = arith.constant 0 : i32
    %c0_i32_1 = arith.constant 0 : i32
    return %c0_i32, %c0_i32_0 : i32, i32
  }
  func.func @transform_4(%arg0: i32) -> (i32, i32) {
    %c0_i32 = arith.constant 0 : i32
    %c0_i32_0 = arith.constant 0 : i32
    %c0_i32_1 = arith.constant 0 : i32
    return %c0_i32, %c0_i32_0 : i32, i32
  }
  func.func @transform_5(%arg0: i32) -> (i32, i32) {
    %c0_i32 = arith.constant 0 : i32
    %c0_i32_0 = arith.constant 0 : i32
    %c0_i32_1 = arith.constant 0 : i32
    return %c0_i32, %c0_i32_0 : i32, i32
  }
  func.func @transform_6(%arg0: i32) -> (i32, i32) {
    %c0_i32 = arith.constant 0 : i32
    %c0_i32_0 = arith.constant 0 : i32
    %c0_i32_1 = arith.constant 0 : i32
    return %c0_i32, %c0_i32_0 : i32, i32
  }
  func.func @transform_7(%arg0: i32) -> (i32, i32) {
    %c0_i32 = arith.constant 0 : i32
    %c0_i32_0 = arith.constant 0 : i32
    %c0_i32_1 = arith.constant 0 : i32
    return %c0_i32, %c0_i32_0 : i32, i32
  }
  func.func @transform_8(%arg0: i32) -> (i32, i32) {
    %c0_i32 = arith.constant 0 : i32
    %c0_i32_0 = arith.constant 0 : i32
    %c0_i32_1 = arith.constant 0 : i32
    return %c0_i32, %c0_i32_0 : i32, i32
  }
  func.func @transform_9(%arg0: i32) -> (i32, i32) {
    %c0_i32 = arith.constant 0 : i32
    %c0_i32_0 = arith.constant 0 : i32
    %c0_i32_1 = arith.constant 0 : i32
    return %c0_i32, %c0_i32_0 : i32, i32
  }
  func.func @transform_10(%arg0: i32) -> (i32, i32) {
    %c0_i32 = arith.constant 0 : i32
    %c0_i32_0 = arith.constant 0 : i32
    %c0_i32_1 = arith.constant 0 : i32
    return %c0_i32, %c0_i32_0 : i32, i32
  }
}

</mosaic_0001>

<bundles_post_ra>
// kernel: cnn2_forward.1
= control target key start
LH: loop header
LB: loop body
LE: loop exit
PB: predicated region body
PF: predicated region fallthrough
CT: control target
= control target key end

     0   :  { %vm67_vm0 = vcmask 785408   ;;  %s743_s0 = inlined_call_operand.vmem [shape: f32[2,96], index: 0, kind: input, shape index: {}]   ;;  %s744_s1 = inlined_call_operand.vmem [shape: f32[96,232], index: 1, kind: input, shape index: {}]   ;;  %s745_s2 = inlined_call_operand.vmem [shape: f32[1,232], index: 2, kind: input, shape index: {}]   ;;  %s746_s3 = inlined_call_operand.vmem [shape: f32[232,32], index: 3, kind: input, shape index: {}]   ;;  %s747_s4 = inlined_call_operand.vmem [shape: f32[1,32], index: 4, kind: input, shape index: {}]   ;;  %s748_s5 = inlined_call_operand.vmem [shape: f32[232,8], index: 5, kind: input, shape index: {}]   ;;  %s749_s6 = inlined_call_operand.vmem [shape: f32[32,8], index: 6, kind: input, shape index: {}]   ;;  %s750_s7 = inlined_call_operand.vmem [shape: f32[1,8], index: 7, kind: input, shape index: {}]   ;;  %s751_s8 = inlined_call_operand.vmem [shape: f32[8,3], index: 8, kind: input, shape index: {}]   ;;  %s752_s9 = inlined_call_operand.vmem [shape: f32[1,3], index: 9, kind: input, shape index: {}]   ;;  %s753_s10 = inlined_call_operand.hbm [shape: f32[2,3], index: 10, kind: output, shape index: {}]  }
   0x1   :  { %v59_v0 = vld [vmem:[%s744_s1 + $0xb0] sm:$0xff]  ;;  %v60_v1 = vld [vmem:[%s744_s1 + $0xb8] sm:$0xff]  ;;  %v57_v2 = vld [vmem:[%s744_s1 + $0xa0] sm:$0xff] }
   0x2   :  { %75 = vmatpush.msra.mxu0 %v59_v0  ;;  %95 = vmatpush.msra.mxu1 %v60_v1  ;;  %v58_v3 = vld [vmem:[%s744_s1 + $0xa8] sm:$0xff]  ;;  %v55_v4 = vld [vmem:[%s744_s1 + $0x90] sm:$0xff]  ;;  %v56_v5 = vld [vmem:[%s744_s1 + $0x98] sm:$0xff] }
   0x3   :  { %v53_v6 = vld [vmem:[%s744_s1 + $0x80] sm:$0xff]  ;;  %v54_v7 = vld [vmem:[%s744_s1 + $0x88] sm:$0xff]  ;;  %v51_v8 = vld [vmem:[%s744_s1 + $0x70] sm:$0xff] }
   0x4   :  { %76 = vmatpush.msra.mxu0 %v57_v2  ;;  %96 = vmatpush.msra.mxu1 %v58_v3  ;;  %v52_v9 = vld [vmem:[%s744_s1 + $0x78] sm:$0xff]  ;;  %v49_v10 = vld [vmem:[%s744_s1 + $0x60] sm:$0xff]  ;;  %v50_v11 = vld [vmem:[%s744_s1 + $0x68] sm:$0xff] }
   0x5   :  { %v141_v12 = vld [vmem:[%s746_s3 + $0xe0] sm:$0xff]  ;;  %v140_v13 = vld [vmem:[%s746_s3 + $0xd8] sm:$0xff]  ;;  %v47_v14 = vld [vmem:[%s744_s1 + $0x50] sm:$0xff] }
   0x6   :  { %77 = vmatpush.msra.mxu0 %v55_v4  ;;  %97 = vmatpush.msra.mxu1 %v56_v5  ;;  %v48_v15 = vld [vmem:[%s744_s1 + $0x58] sm:$0xff]  ;;  %v139_v17 = vld [vmem:[%s746_s3 + $0xd0] sm:$0xff]  ;;  %v45_v19 = vld [vmem:[%s744_s1 + $0x40] sm:$0xff] }
   0x7   :  { %173 = vmatpush.msra.mxu3 %v141_v12  ;;  %v128_v16 = vld [vmem:[%s746_s3 + $0x78] sm:$0xff]  ;;  %v127_v18 = vld [vmem:[%s746_s3 + $0x70] sm:$0xff]  ;;  %v46_v20 = vld [vmem:[%s744_s1 + $0x48] sm:$0xff] }
   0x8   :  { %78 = vmatpush.msra.mxu0 %v53_v6  ;;  %98 = vmatpush.msra.mxu1 %v54_v7  ;;  %v138_v21 = vld [vmem:[%s746_s3 + $0xc8] sm:$0xff]  ;;  %v43_v23 = vld [vmem:[%s744_s1 + $0x30] sm:$0xff]  ;;  %v44_v24 = vld [vmem:[%s744_s1 + $0x38] sm:$0xff] }
   0x9   :  { %174 = vmatpush.msra.mxu3 %v140_v13  ;;  %150 = vmatpush.msra.mxu2 %v128_v16  ;;  %v126_v22 = vld [vmem:[%s746_s3 + $0x68] sm:$0xff]  ;;  %v137_v25 = vld [vmem:[%s746_s3 + $0xc0] sm:$0xff]  ;;  %v136_v29 = vld [vmem:[%s746_s3 + $0xb8] sm:$0xff] }
   0xa   :  { %79 = vmatpush.msra.mxu0 %v51_v8  ;;  %99 = vmatpush.msra.mxu1 %v52_v9  ;;  %v125_v26 = vld [vmem:[%s746_s3 + $0x60] sm:$0xff]  ;;  %v42_v28 = vld [vmem:[%s744_s1 + $0x28] sm:$0xff]  ;;  %v124_v30 = vld [vmem:[%s746_s3 + $0x58] sm:$0xff] }
   0xb   :  { %175 = vmatpush.msra.mxu3 %v139_v17  ;;  %151 = vmatpush.msra.mxu2 %v127_v18  ;;  %v41_v27 = vld [vmem:[%s744_s1 + $0x20] sm:$0xff]  ;;  %v39_v31 = vld [vmem:[%s744_s1 + $0x10] sm:$0xff]  ;;  %v40_v32 = vld [vmem:[%s744_s1 + $0x18] sm:$0xff] }
   0xc   :  { %80 = vmatpush.msra.mxu0 %v49_v10  ;;  %100 = vmatpush.msra.mxu1 %v50_v11  ;;  %v135_v33 = vld [vmem:[%s746_s3 + $0xb0] sm:$0xff]  ;;  %v37_v35 = vld [vmem:[%s744_s1] sm:$0xff]  ;;  %v38_v36 = vld [vmem:[%s744_s1 + $0x8] sm:$0xff] }
   0xd   :  { %176 = vmatpush.msra.mxu3 %v138_v21  ;;  %152 = vmatpush.msra.mxu2 %v126_v22  ;;  %v123_v34 = vld [vmem:[%s746_s3 + $0x50] sm:$0xff]  ;;  %v36_v37 = vld [vmem:[%s743_s0] sm:$0x3]  ;;  %v206_v38 = vld [vmem:[%s748_s5 + $0x78] sm:$0xff] }
   0xe   :  { %81 = vmatpush.msra.mxu0 %v47_v14  ;;  %101 = vmatpush.msra.mxu1 %v48_v15  ;;  %v134_v39 = vld [vmem:[%s746_s3 + $0xa8] sm:$0xff]  ;;  %v205_v40 = vld [vmem:[%s748_s5 + $0x70] sm:$0xff]  ;;  %v133_v42 = vld [vmem:[%s746_s3 + $0xa0] sm:$0xff] }
   0xf   :  { %177 = vmatpush.msra.mxu3 %v137_v25  ;;  %153 = vmatpush.msra.mxu2 %v125_v26  ;;  %v122_v41 = vld [vmem:[%s746_s3 + $0x48] sm:$0xff]  ;;  %v121_v43 = vld [vmem:[%s746_s3 + $0x40] sm:$0xff] }
  0x10   :  { %82 = vmatpush.msra.mxu0 %v45_v19  ;;  %102 = vmatpush.msra.mxu1 %v46_v20 }
  0x11   :  { %178 = vmatpush.msra.mxu3 %v136_v29  ;;  %154 = vmatpush.msra.mxu2 %v124_v30 }
  0x12   :  { %83 = vmatpush.msra.mxu0 %v43_v23  ;;  %103 = vmatpush.msra.mxu1 %v44_v24 }
  0x13   :  { %179 = vmatpush.msra.mxu3 %v135_v33  ;;  %155 = vmatpush.msra.mxu2 %v123_v34 }
  0x14   :  { %84 = vmatpush.msra.mxu0 %v41_v27  ;;  %104 = vmatpush.msra.mxu1 %v42_v28 }
  0x15   :  { %180 = vmatpush.msra.mxu3 %v134_v39 }
  0x16   :  { %85 = vmatpush.msra.mxu0 %v39_v31  ;;  %105 = vmatpush.msra.mxu1 %v40_v32 }
  0x18   :  { %86 = vmatpush.msra.mxu0 %v37_v35  ;;  %106 = vmatpush.msra.mxu1 %v38_v36 }
  0x19   :  { %365 = vmatmul.msk.f32.vlgmr.msra.gmra.mxu0 %vm67_vm0, %v36_v37  ;;  %366 = vmatmul.msk.f32.vlgmr.msra.gmra.mxu1 %vm67_vm0, %v36_v37 }
  0x1a   :  { %248 = vmatpush.msrb.mxu1 %v206_v38 }
  0x1b   :  { %15 = vsyncpa [#allocation3], 0  ;;  %v204_v44 = vld [vmem:[%s748_s5 + $0x68] sm:$0xff]  ;;  %v132_v45 = vld [vmem:[%s746_s3 + $0x98] sm:$0xff]  ;;  %156 = vmatpush.msra.mxu2 %v122_v41  ;;  %181 = vmatpush.msra.mxu3 %v133_v42  ;;  %vm146_vm1 = vcmask 850944   ;;  %vm224_vm2 = vcmask 261120  }
  0x1c   :  { %249 = vmatpush.msrb.mxu1 %v205_v40  ;;  %v120_v46 = vld [vmem:[%s746_s3 + $0x38] sm:$0xff]  ;;  %v203_v47 = vld [vmem:[%s748_s5 + $0x60] sm:$0xff]  ;;  %v131_v48 = vld [vmem:[%s746_s3 + $0x90] sm:$0xff]  ;;  %vm299_vm3 = vcmask 64512   ;;  %vm323_vm4 = vcmask 17408   ;;  %s356_s23 = sshll.u32 %s753_s10, 4  ;;  %s357_s23 = int_to_ptr.hbm [resolvable:$true] %s356_s23 }
  0x1d   :  { %157 = vmatpush.msra.mxu2 %v121_v43  ;;  %182 = vmatpush.msra.mxu3 %v132_v45  ;;  %v119_v49 = vld [vmem:[%s746_s3 + $0x30] sm:$0xff]  ;;  %v202_v50 = vld [vmem:[%s748_s5 + $0x58] sm:$0xff]  ;;  %v130_v51 = vld [vmem:[%s746_s3 + $0x88] sm:$0xff] }
  0x1e   :  { %250 = vmatpush.msrb.mxu1 %v204_v44  ;;  %v118_v52 = vld [vmem:[%s746_s3 + $0x28] sm:$0xff]  ;;  %v201_v53 = vld [vmem:[%s748_s5 + $0x50] sm:$0xff]  ;;  %v129_v54 = vld [vmem:[%s746_s3 + $0x80] sm:$0xff] }
  0x1f   :  { %158 = vmatpush.msra.mxu2 %v120_v46  ;;  %183 = vmatpush.msra.mxu3 %v131_v48  ;;  %v219_v55 = vld [vmem:[%s748_s5 + $0xe0] sm:$0xff]  ;;  %v200_v57 = vld [vmem:[%s748_s5 + $0x48] sm:$0xff]  ;;  %v218_v58 = vld [vmem:[%s748_s5 + $0xd8] sm:$0xff] }
  0x20   :  { %251 = vmatpush.msrb.mxu1 %v203_v47  ;;  %v117_v56 = vld [vmem:[%s746_s3 + $0x20] sm:$0xff]  ;;  %v116_v59 = vld [vmem:[%s746_s3 + $0x18] sm:$0xff]  ;;  %v217_v61 = vld [vmem:[%s748_s5 + $0xd0] sm:$0xff] }
  0x21   :  { %159 = vmatpush.msra.mxu2 %v119_v49  ;;  %184 = vmatpush.msra.mxu3 %v130_v51  ;;  %v199_v60 = vld [vmem:[%s748_s5 + $0x40] sm:$0xff]  ;;  %v198_v62 = vld [vmem:[%s748_s5 + $0x38] sm:$0xff]  ;;  %v216_v63 = vld [vmem:[%s748_s5 + $0xc8] sm:$0xff] }
  0x22   :  { %252 = vmatpush.msrb.mxu1 %v202_v50  ;;  %v197_v0 = vld [vmem:[%s748_s5 + $0x30] sm:$0xff]  ;;  %v215_v1 = vld [vmem:[%s748_s5 + $0xc0] sm:$0xff]  ;;  %v196_v2 = vld [vmem:[%s748_s5 + $0x28] sm:$0xff] }
  0x23   :  { %160 = vmatpush.msra.mxu2 %v118_v52  ;;  %185 = vmatpush.msra.mxu3 %v129_v54  ;;  %v214_v3 = vld [vmem:[%s748_s5 + $0xb8] sm:$0xff]  ;;  %v195_v4 = vld [vmem:[%s748_s5 + $0x20] sm:$0xff]  ;;  %v115_v6 = vld [vmem:[%s746_s3 + $0x10] sm:$0xff] }
  0x24   :  { %253 = vmatpush.msrb.mxu1 %v201_v53  ;;  %v194_v5 = vld [vmem:[%s748_s5 + $0x18] sm:$0xff]  ;;  %v193_v7 = vld [vmem:[%s748_s5 + $0x10] sm:$0xff]  ;;  %v114_v9 = vld [vmem:[%s746_s3 + $0x8] sm:$0xff] }
  0x25   :  { %271 = vmatpush.msrb.mxu3 %v219_v55  ;;  %161 = vmatpush.msra.mxu2 %v117_v56  ;;  %v213_v8 = vld [vmem:[%s748_s5 + $0xb0] sm:$0xff]  ;;  %v192_v10 = vld [vmem:[%s748_s5 + $0x8] sm:$0xff]  ;;  %v113_v12 = vld [vmem:[%s746_s3] sm:$0xff] }
  0x26   :  { %254 = vmatpush.msrb.mxu1 %v200_v57  ;;  %v212_v11 = vld [vmem:[%s748_s5 + $0xa8] sm:$0xff]  ;;  %v191_v13 = vld [vmem:[%s748_s5] sm:$0xff]  ;;  %v210_v15 = vld [vmem:[%s748_s5 + $0x98] sm:$0xff] }
  0x27   :  { %272 = vmatpush.msrb.mxu3 %v218_v58  ;;  %162 = vmatpush.msra.mxu2 %v116_v59  ;;  %v211_v14 = vld [vmem:[%s748_s5 + $0xa0] sm:$0xff]  ;;  %v209_v16 = vld [vmem:[%s748_s5 + $0x90] sm:$0xff]  ;;  %v208_v17 = vld [vmem:[%s748_s5 + $0x88] sm:$0xff] }
  0x28   :  { %255 = vmatpush.msrb.mxu1 %v199_v60  ;;  %v207_v18 = vld [vmem:[%s748_s5 + $0x80] sm:$0xff]  ;;  %v223_v28 = vld [vmem:[%s749_s6 + $0x18] sm:$0xff]  ;;  %v222_v29 = vld [vmem:[%s749_s6 + $0x10] sm:$0xff] }
  0x29   :  { %273 = vmatpush.msrb.mxu3 %v217_v61  ;;  %163 = vmatpush.msra.mxu2 %v115_v6  ;;  %v61_v19 = vld [vmem:[%s745_s2] sm:$0x3]  ;;  %v221_v30 = vld [vmem:[%s749_s6 + $0x8] sm:$0xff] }
  0x2a   :  { %256 = vmatpush.msrb.mxu1 %v198_v62  ;;  %v63_v20 = vperm.slane %v61_v19, 0  ;;  %v64_v21 = vperm.slane %v61_v19, 1  ;;  %240 = vmatpush.msrb.mxu0 %v223_v28  ;;  %v220_v31 = vld [vmem:[%s749_s6] sm:$0xff] }
  0x2b   :  { %274 = vmatpush.msrb.mxu3 %v216_v63  ;;  %164 = vmatpush.msra.mxu2 %v114_v9  ;;  %v372_v32 = vld [vmem:[%s747_s4] ss:$0 sm:$0xff] }
  0x2c   :  { %257 = vmatpush.msrb.mxu1 %v197_v0  ;;  %241 = vmatpush.msrb.mxu0 %v222_v29  ;;  %v294_v38 = vld [vmem:[%s751_s8] sm:$0xff] }
  0x2d   :  { %275 = vmatpush.msrb.mxu3 %v215_v1  ;;  %165 = vmatpush.msra.mxu2 %v113_v12  ;;  %v373_v42 = vld [vmem:[%s750_s7] ss:$0 sm:$0xff]  ;;  %s405_s7 = smov [#allocation2]  }
  0x2e   :  { %258 = vmatpush.msrb.mxu1 %v196_v2  ;;  %242 = vmatpush.msrb.mxu0 %v221_v30  ;;  %v374_v47 = vld [vmem:[%s752_s9] ss:$0 sm:$0xff]  ;;  %s354_s8 = sshll.u32 %s405_s7, 4  ;;  %s355_s8 = int_to_ptr.vmem [resolvable:$true] %s354_s8 }
  0x2f   :  { %276 = vmatpush.msrb.mxu3 %v214_v3 }
  0x30   :  { %259 = vmatpush.msrb.mxu1 %v195_v4  ;;  %243 = vmatpush.msrb.mxu0 %v220_v31 }
  0x31   :  { %277 = vmatpush.msrb.mxu3 %v213_v8 }
  0x32   :  { %260 = vmatpush.msrb.mxu1 %v194_v5  ;;  %318 = vmatpush.msra.mxu0 %v294_v38 }
  0x33   :  { %278 = vmatpush.msrb.mxu3 %v212_v11 }
  0x34   :  { %261 = vmatpush.msrb.mxu1 %v193_v7 }
  0x35   :  { %279 = vmatpush.msrb.mxu3 %v211_v14 }
  0x36   :  { %262 = vmatpush.msrb.mxu1 %v192_v10 }
  0x37   :  { %280 = vmatpush.msrb.mxu3 %v210_v15 }
  0x38   :  { %263 = vmatpush.msrb.mxu1 %v191_v13 }
  0x39   :  { %281 = vmatpush.msrb.mxu3 %v209_v16 }
  0x3b   :  { %282 = vmatpush.msrb.mxu3 %v208_v17 }
  0x3d   :  { %283 = vmatpush.msrb.mxu3 %v207_v18 }
  0x96   :  { %v88_v22 = vpop.f32.mrf.mxu0  ;;  %v108_v23 = vpop.f32.mrf.mxu1 }
  0x97   :  { %v89_v24 = vadd.f32 %v88_v22, %v63_v20  ;;  %v109_v25 = vadd.f32 %v108_v23, %v64_v21 }
  0x99   :  { %v111_v26 = vmax.f32 %v89_v24, 0.0  ;;  %v112_v27 = vmax.f32 %v109_v25, 0.0 }
  0x9b   :  { %166 = vmatmul.f32.vlgmr.msra.gmra.mxu2 %v111_v26  ;;  %367 = vmatmul.msk.f32.vlgmr.msra.gmra.mxu3 %vm146_vm1, %v112_v27 }
  0x9c   :  { %264 = vmatmul.f32.vlgmr.msrb.gmra.mxu1 %v111_v26 }
  0xa3   :  { %369 = vmatmul.msk.f32.vlgmr.msrb.gmra.mxu3 %vm146_vm1, %v112_v27 }
 0x119   :  { %v265_v39 = vpop.f32.mrf.mxu1 }
 0x11e   :  { %v167_v33 = vpop.f32.mrf.mxu2  ;;  %v187_v35 = vpop.f32.mrf.mxu3 }
 0x11f   :  { %v168_v34 = vadd.f32 %v372_v32, %v167_v33 }
 0x121   :  { %v188_v36 = vadd.f32 %v187_v35, %v168_v34 }
 0x123   :  { %v190_v37 = vmax.f32 %v188_v36, 0.0 }
 0x125   :  { %368 = vmatmul.msk.f32.vlgmr.msrb.gmra.mxu0 %vm224_vm2, %v190_v37 }
 0x126   :  { %v285_v43 = vpop.f32.mrf.mxu3 }
 0x1a2   :  { %v245_v40 = vpop.f32.mrf.mxu0 }
 0x1a3   :  { %v266_v41 = vadd.f32 %v265_v39, %v245_v40 }
 0x1a5   :  { %v286_v44 = vadd.f32 %v285_v43, %v266_v41 }
 0x1a7   :  { %v292_v45 = vadd.f32 %v373_v42, %v286_v44 }
 0x1a9   :  { %v293_v46 = vmax.f32 %v292_v45, 0.0 }
 0x1ab   :  { %370 = vmatmul.msk.f32.vlgmr.msra.gmra.mxu0 %vm299_vm3, %v293_v46 }
 0x228   :  { %v320_v48 = vpop.f32.mrf.mxu0 }
 0x229   :  { %v321_v49 = vadd.f32 %v374_v47, %v320_v48 }
 0x22b   :  { %v324_v50 = vsel %vm323_vm4, %v321_v49, -inf }
 0x22c   :  { %325 = vmax.xlane.f32.xlu0 %v324_v50 }
 0x29f   :  { %v326_v51 = vpop.xlane.xlu0 %325 }
 0x2a0   :  { %v327_v52 = vsub.f32 %v321_v49, %v326_v51 }
 0x2a2   :  { %v328_v53 = vmul.f32 1.442695, %v327_v52 }
 0x2a4   :  { %375 = vpow2.f32 %v328_v53 }
 0x2aa   :  { %v376_v54 = vpop.eup %375 }
 0x2ab   :  { %v330_v55 = vsel %vm323_vm4, %v376_v54, 0.0 }
 0x2ac   :  { %331 = vadd.xlane.f32.xlu0 %v330_v55 }
 0x31f   :  { %v332_v56 = vpop.xlane.xlu0 %331 }
 0x320   :  { %377 = vrcp.f32 %v332_v56  ;;  %v344_v60 = vand.u32 2147483648, %v332_v56  ;;  %v342_v62 = vand.u32 2147483647, %v332_v56  ;;  %vm338_vm6 = vweird.f32 %v332_v56 }
 0x322   :  { %v345_v0 = vor.u32 1.1754944e-38, %v344_v60  ;;  %vm343_vm8 = vcmp.eq.f32.partialorder %v342_v62, 8.507059e+37 }
 0x326   :  { %v378_v57 = vpop.eup %377 }
 0x327   :  { %v334_v58 = vmul.f32 %v378_v57, %v332_v56  ;;  %vm339_vm5 = vweird.f32 %v378_v57 }
 0x328   :  { %vm340_vm7 = vmor %vm338_vm6, %vm339_vm5 }
 0x329   :  { %v335_v59 = vsub.f32 1.0, %v334_v58 }
 0x32b   :  { %v336_v61 = vmul.f32 %v378_v57, %v335_v59 }
 0x32d   :  { %v337_v63 = vadd.f32 %v378_v57, %v336_v61 }
 0x32f   :  { %v341_v1 = vsel %vm340_vm7, %v378_v57, %v337_v63 }
 0x330   :  { %v346_v2 = vsel %vm343_vm8, %v345_v0, %v341_v1 }
 0x331   :  { %v347_v3 = vmul.f32 %v376_v54, %v346_v2 }
 0x333   :  { %348 = vst.msk [vmem:[#allocation2] sm:$0x3] %vm323_vm4, %v347_v3 }
 0x334   :  { %359 = dma.vmem_to_hbm [thread:$0]  %s355_s8, 32, %s357_s23, [#allocation3]  }
 0x335   :  { %403 = dma.done.wait [#allocation3], 32  }
 0x336   :  { %404 = vsyncadd [#allocation3], 4294967264 }
 0x337   :  { %364 = vsyncpa [#allocation3], 1 }

</bundles_post_ra>
